<compile_context>
chip_gen: v7x
topology: tpu7x:2x2x1
jax: 0.10.0
libtpu: 0.0.40
codegen_flags: <defaults>
</compile_context>

<pallas_src>
import functools

import jax
import jax.numpy as jnp
from jax.experimental import pallas as pl
from jax.experimental.pallas import tpu as pltpu


def _round_up(n: int, m: int) -> int:
    return ((n + m - 1) // m) * m


def _cdiv(a: int, b: int) -> int:
    return (a + b - 1) // b


# -----------------------------------------------------------------------------
# Kernels
# -----------------------------------------------------------------------------
def _mu_kernel(x_ref, w_ref, b_ref, mu_ref, *, unbounded, max_mu):
    """Unconditioned-sigma path: only the mu head is computed in the kernel."""
    x = x_ref[...]
    mu = jnp.dot(x, w_ref[...], preferred_element_type=jnp.float32) + b_ref[...]
    if not unbounded:
        mu = max_mu * jnp.tanh(mu)
    mu_ref[...] = mu.astype(mu_ref.dtype)


def _fused_mu_sigma_kernel(x_ref, w_ref, b_ref, out_ref, *, unbounded, max_mu,
                           sigma_min, sigma_max, output_dim):
    """Conditioned-sigma path: one MXU pass over [w_mu | w_sigma].

    Output is a single packed block: lanes [0, output_dim) hold mu,
    lanes [output_dim, 2*output_dim) hold sigma.  The nonlinearity is selected
    per-lane with an iota mask (both tanh and exp hit the EUP slot; the masked
    select is a cheap VPU op) so no value re-slicing happens in-kernel.
    """
    x = x_ref[...]
    r = jnp.dot(x, w_ref[...], preferred_element_type=jnp.float32) + b_ref[...]
    mu = r if unbounded else max_mu * jnp.tanh(r)
    sigma = jnp.exp(jnp.clip(r, sigma_min, sigma_max))
    lane = jax.lax.broadcasted_iota(jnp.int32, r.shape, 1)
    out_ref[...] = jnp.where(lane < output_dim, mu, sigma).astype(out_ref.dtype)


# -----------------------------------------------------------------------------
# Tiling / VMEM guard
# -----------------------------------------------------------------------------
def _choose_tiling(batch, latent_dim, out_width, block_batch, itemsize):
    # Number of batch tiles: enough to respect block_batch, at least 2 when the
    # batch is large enough to keep both v7x TensorCores busy, and balanced so
    # the last tile is not mostly padding (e.g. batch=520 -> 2x264, not 512+pad).
    n_tiles = max(1, _cdiv(batch, block_batch))
    if n_tiles == 1 and batch >= 64:
        n_tiles = 2
    tb = _round_up(_cdiv(batch, n_tiles), 8)

    # VMEM guard, budgeted against the smallest physical VMEM (v7x: 64 MiB):
    # double-buffered x tile + double-buffered output tile + resident weights.
    def vmem_bytes(t):
        return (2 * t * latent_dim * itemsize        # x, double-buffered
                + 2 * t * out_width * itemsize       # packed output, double-buffered
                + latent_dim * out_width * 4         # resident weights
                + out_width * 4)                     # resident bias

    budget = 40 * 2 ** 20
    while tb > 8 and vmem_bytes(tb) > budget:
        tb = max(8, _round_up(tb // 2, 8))
    n_tiles = _cdiv(batch, tb)
    return tb, n_tiles * tb, n_tiles, vmem_bytes(tb)


# -----------------------------------------------------------------------------
# Wrapper
# -----------------------------------------------------------------------------
def tanh_diag_gaussian_forward(logits, params, *, output_dim,
                               unbounded=False, conditioned_sigma=False,
                               max_mu=1.0, sigma_min=-5.0, sigma_max=2.0,
                               block_batch=512):
    """Returns (mu, sigma) of the TanhNormal distribution.

    mu: (batch, output_dim).  sigma: (batch, output_dim) when
    conditioned_sigma=True, else a broadcastable (1, output_dim) array (the
    state-independent sigma is never materialized at batch size).
    """
    batch, latent_dim = logits.shape
    out_width = 2 * output_dim if conditioned_sigma else output_dim
    itemsize = jnp.dtype(logits.dtype).itemsize

    tb, b_pad, n_tiles, vmem_est = _choose_tiling(
        batch, latent_dim, out_width, block_batch, itemsize)
    if b_pad != batch:
        logits = jnp.pad(logits, ((0, b_pad - batch), (0, 0)))

    # Feature dims equal the full array dims (no 128 padding): blocks with a
    # last dim == array last dim are legal; masked stores cost far less than
    # 21x padded writeback for small action dims.
    x_spec = pl.BlockSpec((tb, latent_dim), lambda i: (i, 0))
    w_spec = pl.BlockSpec((latent_dim, out_width), lambda i: (0, 0))  # VMEM-resident
    b_spec = pl.BlockSpec((1, out_width), lambda i: (0, 0))           # VMEM-resident
    o_spec = pl.BlockSpec((tb, out_width), lambda i: (i, 0))

    cp_kwargs = dict(dimension_semantics=("parallel",))
    if vmem_est > 12 * 2 ** 20:  # above the v5e default scoped-VMEM comfort zone
        cp_kwargs["vmem_limit_bytes"] = int(min(60 * 2 ** 20, 2 * vmem_est))
    cparams = pltpu.CompilerParams(**cp_kwargs)

    out_shape = jax.ShapeDtypeStruct((b_pad, out_width), logits.dtype)

    if conditioned_sigma:
        kernel = functools.partial(
            _fused_mu_sigma_kernel, unbounded=unbounded, max_mu=max_mu,
            sigma_min=sigma_min, sigma_max=sigma_max, output_dim=output_dim)
        packed = pl.pallas_call(
            kernel,
            out_shape=out_shape,
            grid=(n_tiles,),
            in_specs=[x_spec, w_spec, b_spec],
            out_specs=o_spec,
            compiler_params=cparams,
        )(logits, params["w_musig"], params["b_musig"])
        mu = packed[:batch, :output_dim]
        sigma = packed[:batch, output_dim:]
    else:
        kernel = functools.partial(_mu_kernel, unbounded=unbounded, max_mu=max_mu)
        mu = pl.pallas_call(
            kernel,
            out_shape=out_shape,
            grid=(n_tiles,),
            in_specs=[x_spec, w_spec, b_spec],
            out_specs=o_spec,
            compiler_params=cparams,
        )(logits, params["w_mu"], params["b_mu"])
        mu = mu[:batch]
        # State-independent sigma: computed outside the kernel, broadcastable
        # against mu.  No full-size constant is ever written to HBM.
        sigma = jnp.exp(params["log_sigma"]).astype(mu.dtype)

    return mu, sigma


def init_params(key, latent_dim, output_dim, conditioned_sigma=False):
    """torch.nn.Linear default init (U[-1/sqrt(fan_in), 1/sqrt(fan_in)]).

    For conditioned_sigma the two heads are stored concatenated so the kernel
    can compute [mu | log_sigma] in a single MXU pass.
    """
    def linear(k, fan_in, fan_out):
        kw, kb = jax.random.split(k)
        bound = 1.0 / jnp.sqrt(float(fan_in))
        w = jax.random.uniform(kw, (fan_in, fan_out), jnp.float32, -bound, bound)
        b = jax.random.uniform(kb, (1, fan_out), jnp.float32, -bound, bound)
        return w, b

    k_mu, k_sig = jax.random.split(key)
    w_mu, b_mu = linear(k_mu, latent_dim, output_dim)
    if conditioned_sigma:
        w_sig, b_sig = linear(k_sig, latent_dim, output_dim)
        return {"w_musig": jnp.concatenate([w_mu, w_sig], axis=1),
                "b_musig": jnp.concatenate([b_mu, b_sig], axis=1)}
    # torch default is zeros; random values here so the demo exercises the
    # exp path non-trivially.
    log_sigma = jax.random.uniform(k_sig, (1, output_dim), jnp.float32, -0.5, 0.5)
    return {"w_mu": w_mu, "b_mu": b_mu, "log_sigma": log_sigma}


if __name__ == "__main__":
    batch, latent_dim, output_dim = 8, 32, 6
    max_mu, sigma_min, sigma_max = 1.0, -5.0, 2.0

    key = jax.random.PRNGKey(0)
    k_x, k_p1, k_p2 = jax.random.split(key, 3)
    logits = jax.random.normal(k_x, (batch, latent_dim), jnp.float32)

    ok = True

    # --- path 1: default TanhDiagGaussian (unconditioned sigma, bounded mu) ---
    p1 = init_params(k_p1, latent_dim, output_dim, conditioned_sigma=False)
    mu1, sig1 = tanh_diag_gaussian_forward(
        logits, p1, output_dim=output_dim, conditioned_sigma=False, max_mu=max_mu)
    mu1, sig1 = jax.block_until_ready((mu1, sig1))
    mu1_ref = max_mu * jnp.tanh(logits @ p1["w_mu"] + p1["b_mu"])
    sig1_ref = jnp.exp(p1["log_sigma"])
    ok &= bool(jnp.allclose(mu1, mu1_ref, atol=1e-5, rtol=1e-5))
    ok &= bool(jnp.allclose(jnp.broadcast_to(sig1, mu1.shape),
                            jnp.broadcast_to(sig1_ref, mu1_ref.shape),
                            atol=1e-5, rtol=1e-5))
    assert mu1.shape == (batch, output_dim) and sig1.shape == (1, output_dim)

    # --- path 2: conditioned sigma (fused single-dot head) ---
    p2 = init_params(k_p2, latent_dim, output_dim, conditioned_sigma=True)
    mu2, sig2 = tanh_diag_gaussian_forward(
        logits, p2, output_dim=output_dim, conditioned_sigma=True,
        max_mu=max_mu, sigma_min=sigma_min, sigma_max=sigma_max)
    mu2, sig2 = jax.block_until_ready((mu2, sig2))
    w_mu2, w_s2 = p2["w_musig"][:, :output_dim], p2["w_musig"][:, output_dim:]
    b_mu2, b_s2 = p2["b_musig"][:, :output_dim], p2["b_musig"][:, output_dim:]
    mu2_ref = max_mu * jnp.tanh(logits @ w_mu2 + b_mu2)
    sig2_ref = jnp.exp(jnp.clip(logits @ w_s2 + b_s2, sigma_min, sigma_max))
    ok &= bool(jnp.allclose(mu2, mu2_ref, atol=1e-5, rtol=1e-5))
    ok &= bool(jnp.allclose(sig2, sig2_ref, atol=1e-5, rtol=1e-5))
    assert mu2.shape == (batch, output_dim) and sig2.shape == (batch, output_dim)

    # --- path 3: unbounded mu (no tanh) ---
    mu3, _ = tanh_diag_gaussian_forward(
        logits, p1, output_dim=output_dim, conditioned_sigma=False, unbounded=True)
    mu3 = jax.block_until_ready(mu3)
    ok &= bool(jnp.allclose(mu3, logits @ p1["w_mu"] + p1["b_mu"],
                            atol=1e-5, rtol=1e-5))

    assert ok
    print("KERNEL_OK")
</pallas_src>

<mosaic_0001>
module attributes {stable_mosaic.version = 11 : i64} {
  func.func @_mu_kernel(%arg0: i32, %arg1: memref<8x32xf32, #tpu.memory_space<vmem>>, %arg2: memref<32x6xf32, #tpu.memory_space<vmem>>, %arg3: memref<1x6xf32, #tpu.memory_space<vmem>>, %arg4: memref<8x6xf32, #tpu.memory_space<vmem>>) attributes {dimension_semantics = [#tpu.dimension_semantics<parallel>], iteration_bounds = array<i64: 1>, scalar_prefetch = 0 : i64, scratch_operands = 0 : i64, tpu.core_type = #tpu.core_type<tc>, window_params = [{transform_indices = @transform_0, window_bounds = array<i64: 8, 32>}, {pipeline_mode = #tpu.pipeline_mode<synchronous>, transform_indices = @transform_1, window_bounds = array<i64: 32, 6>}, {pipeline_mode = #tpu.pipeline_mode<synchronous>, transform_indices = @transform_2, window_bounds = array<i64: 1, 6>}, {transform_indices = @transform_3, window_bounds = array<i64: 8, 6>}]} {
    %c0 = arith.constant 0 : index
    %c0_0 = arith.constant 0 : index
    %0 = vector.load %arg1[%c0, %c0_0] : memref<8x32xf32, #tpu.memory_space<vmem>>, vector<8x32xf32>
    %c0_1 = arith.constant 0 : index
    %c0_2 = arith.constant 0 : index
    %1 = vector.load %arg2[%c0_1, %c0_2] : memref<32x6xf32, #tpu.memory_space<vmem>>, vector<32x6xf32>
    %cst = arith.constant dense<0.000000e+00> : vector<8x6xf32>
    %2 = tpu.matmul %0, %1, %cst {dimension_numbers = #tpu.dot_dimension_numbers<[1], [0], [0], [1], [0, 0, 1, 1], [], []>} : vector<8x32xf32>, vector<32x6xf32>, vector<8x6xf32> -> vector<8x6xf32>
    %c0_3 = arith.constant 0 : index
    %c0_4 = arith.constant 0 : index
    %3 = vector.load %arg3[%c0_3, %c0_4] : memref<1x6xf32, #tpu.memory_space<vmem>>, vector<1x6xf32>
    %4 = vector.broadcast %3 : vector<1x6xf32> to vector<8x6xf32>
    %5 = arith.addf %2, %4 : vector<8x6xf32>
    %6 = math.tanh %5 : vector<8x6xf32>
    %cst_5 = arith.constant 1.000000e+00 : f32
    %7 = vector.broadcast %cst_5 : f32 to vector<8x6xf32>
    %8 = arith.mulf %7, %6 : vector<8x6xf32>
    %c0_6 = arith.constant 0 : index
    %c0_7 = arith.constant 0 : index
    %9 = vector.load %arg4[%c0_6, %c0_7] : memref<8x6xf32, #tpu.memory_space<vmem>>, vector<8x6xf32>
    tpu.vector_store %arg4[%c0_6, %c0_7], %8 {strides = array<i32>} : memref<8x6xf32, #tpu.memory_space<vmem>>, vector<8x6xf32>,
    return
  }
  func.func @transform_0(%arg0: i32) -> (i32, i32) {
    %c0_i32 = arith.constant 0 : i32
    %c0_i32_0 = arith.constant 0 : i32
    return %arg0, %c0_i32 : i32, i32
  }
  func.func @transform_1(%arg0: i32) -> (i32, i32) {
    %c0_i32 = arith.constant 0 : i32
    %c0_i32_0 = arith.constant 0 : i32
    %c0_i32_1 = arith.constant 0 : i32
    return %c0_i32, %c0_i32_0 : i32, i32
  }
  func.func @transform_2(%arg0: i32) -> (i32, i32) {
    %c0_i32 = arith.constant 0 : i32
    %c0_i32_0 = arith.constant 0 : i32
    %c0_i32_1 = arith.constant 0 : i32
    return %c0_i32, %c0_i32_0 : i32, i32
  }
  func.func @transform_3(%arg0: i32) -> (i32, i32) {
    %c0_i32 = arith.constant 0 : i32
    %c0_i32_0 = arith.constant 0 : i32
    return %arg0, %c0_i32 : i32, i32
  }
}

</mosaic_0001>

<bundles_post_ra>
// kernel: tpu_custom_call.1
= control target key start
LH: loop header
LB: loop body
LE: loop exit
PB: predicated region body
PF: predicated region fallthrough
CT: control target
= control target key end

     0   :  { %v172_v3 = vmov 0.0|0.0   ;;  %vm173_vm0 = vmmov 0   ;;  %v174_v6 = vmov 0.0   ;;  %s226_s0 = inlined_call_operand.vmem [shape: f32[8,32], index: 0, kind: input, shape index: {}]   ;;  %s227_s1 = inlined_call_operand.vmem [shape: f32[32,6], index: 1, kind: input, shape index: {}]   ;;  %s228_s2 = inlined_call_operand.vmem [shape: f32[1,6], index: 2, kind: input, shape index: {}]   ;;  %s229_s3 = inlined_call_operand.hbm [shape: f32[8,6], index: 3, kind: output, shape index: {}]  }
   0x1   :  { %v16_v0 = vld [vmem:[%s227_s1] sm:$0xff]  ;;  %v17_v1 = vld [vmem:[%s227_s1 + $0x8] sm:$0xff]  ;;  %v18_v2 = vld [vmem:[%s227_s1 + $0x10] sm:$0xff]  ;;  %136 = vmatprep.subr.bf16.mxu0 %v172_v3  ;;  %133 = vmatprep.mubr.msk.f32.mxu0 %vm173_vm0, %v174_v6 }
   0x2   :  { %v137_v4 = vpack.c.bf16 %v17_v1, %v16_v0  ;;  %v19_v5 = vld [vmem:[%s227_s1 + $0x18] sm:$0xff] }
   0x3   :  { %8 = vsyncpa [#allocation3], 0  ;;  %v140_v7 = vpack.c.bf16 %v19_v5, %v18_v2  ;;  %v15_v8 = vld [vmem:[%s226_s0] sm:$0xff]  ;;  %vm27_vm1 = vcmask 261120   ;;  %s175_s1 = smov [#allocation2]   ;;  %vm102_vm2 = vcmask 48128  }
   0x4   :  { %138 = vmatpush3.bf16.msra.mxu0 %v137_v4  ;;  %v118_v9 = vld [vmem:[%s228_s2] ss:$0 sm:$0xff]  ;;  %s110_s24 = sshll.u32 %s175_s1, 4  ;;  %s111_s24 = int_to_ptr.vmem [resolvable:$true] %s110_s24 }
   0x5   :  { %139 = vmatprep.subr.bf16.mxu0 %v172_v3  ;;  %s148_s25 = scalar_lea.vmem %s111_s24, 128  ;;  %p153_p1 = scmp.lt.s32.totalorder %s111_s24, %s111_s24 }
   0x6   :  { %p149_p0 = scmp.ne.s32.totalorder %s111_s24, %s148_s25  ;;  %p154_p2 = scmp.lt.s32.totalorder %s148_s25, %s148_s25 }
   0x8   :  { %141 = vmatpush3.bf16.msra.mxu0 %v140_v7  ;;  %p155_p3 = por %p154_p2, %p153_p1 }
   0xa   :  { %p156_p4 = pnand %p155_p3, %p149_p0 }
   0xb   :  { %134 = vmatmul.mubr.msk.f32.vlgmr.msra.gmra.mrb[0].mxu0 %vm27_vm1, %v15_v8 }
  0xde   :  { %v97_v10 = vpop.f32.mrb[0].mxu0 }
  0xdf   :  { %v98_v11 = vadd.f32 %v118_v9, %v97_v10  ;;  %v135_v12 = vpop.f32.mrb[1].mxu0 }
  0xe1   :  { %146 = vtanh.f32 %v98_v11 }
  0xeb   :  { %v147_v13 = vpop.eup %146 }
  0xec   :  { %103 = vst.msk [vmem:[#allocation2] sm:$0xff] %vm102_vm2, %v147_v13 }
  0xed   :  { %159 = shalt.err (!%p156_p4)
}
  0xee   :  { %s160_s2 = scalar_lea.hbm %s229_s3, 128 }
  0xef   :  { %p161_p5 = scmp.ne.s32.totalorder %s229_s3, %s160_s2  ;;  %p164_p6 = scmp.lt.u32.totalorder %s160_s2, %s229_s3 }
  0xf1   :  { %p166_p7 = pnand %p164_p6, %p161_p5 }
  0xf3   :  { %169 = shalt.err (!%p166_p7)
}
  0xf4   :  { %113 = dma.vmem_to_hbm [thread:$0]  %s111_s24, 128, %s229_s3, [#allocation3]  }
  0xf5   :  { %170 = dma.done.wait [#allocation3], 128  }
  0xf6   :  { %171 = vsyncadd [#allocation3], 4294967168 }
  0xf7   :  { %117 = vsyncpa [#allocation3], 1 }

</bundles_post_ra>
